<compile_context>
chip_gen: v6e
topology: v6e:2x2x1
jax: 0.10.0
libtpu: 0.0.40
codegen_flags: <defaults>
</compile_context>

<pallas_src>
import jax
import jax.numpy as jnp
from jax import lax
from jax.experimental import pallas as pl
from jax.experimental.pallas import tpu as pltpu


ONEHOT_MAX_VOCAB = 1024      # below this, the MXU one-hot path wins
_ROWS_PER_GROUP = 8          # sublane-aligned store group


def _embedding_gather_kernel(ids_ref, emb_ref, out_ref):
    """Row gather: 8 independent row loads -> one (8, D) aligned store."""
    # ids_ref : (N_pad,) int32 in SMEM  (scalar-prefetched, already clamped)
    # emb_ref : (V, D)   weight dtype   (single VMEM-resident copy, untiled)
    # out_ref : (TM, D)  weight dtype   (one token tile of the output)
    tm = out_ref.shape[0]
    base = pl.program_id(0) * tm
    n_groups = tm // _ROWS_PER_GROUP

    def body(g, carry):
        row0 = pl.multiple_of(g * _ROWS_PER_GROUP, _ROWS_PER_GROUP)
        # 8 independent dynamic row loads -> LLO can overlap sld/vld/vst.
        rows = [
            emb_ref[pl.ds(ids_ref[base + row0 + r], 1), :]
            for r in range(_ROWS_PER_GROUP)
        ]
        # One unmasked, sublane-aligned (8, D) store instead of 8 masked stores.
        out_ref[pl.ds(row0, _ROWS_PER_GROUP), :] = jnp.concatenate(rows, axis=0)
        return carry

    lax.fori_loop(0, n_groups, body, 0, unroll=2)


def _embedding_onehot_kernel(ids_ref, emb_ref, out_ref):
    """Small-vocab fast path: (TM, V) one-hot @ (V, D) table on the MXU."""
    # ids_ref : (TM, 1) int32 VMEM block (already clamped)
    # emb_ref : (V, D)  weight dtype     (single VMEM-resident copy, untiled)
    # out_ref : (TM, D) weight dtype
    tm = out_ref.shape[0]
    v = emb_ref.shape[0]
    ids = ids_ref[...]                                   # (TM, 1)
    iota = lax.broadcasted_iota(jnp.int32, (tm, v), 1)   # (TM, V)
    onehot = (iota == ids).astype(emb_ref.dtype)
    out_ref[...] = jnp.dot(
        onehot, emb_ref[...], preferred_element_type=jnp.float32
    ).astype(out_ref.dtype)


def _vmem_ceiling_bytes():
    """Per-generation usable VMEM ceiling (leaves compiler-scratch headroom)."""
    try:
        kind = jax.devices()[0].device_kind.lower()
    except Exception:
        kind = ""
    if "v5" in kind or "v6" in kind:
        return 100 << 20          # 128 MiB physical VMEM parts
    return 56 << 20               # v7x: 64 MiB per TensorCore (and unknown)


def embedding_forward(x, weight, *, tokens_per_tile=512):
    """x: (B, S) int token ids, weight: (V, D) -> (B, S, D) in weight.dtype."""
    B, S = x.shape
    V, D = weight.shape
    N = B * S

    # Sublane-aligned token tile: at most tokens_per_tile, at least 8.
    TM = min(tokens_per_tile, N)
    TM = max(_ROWS_PER_GROUP, (TM // _ROWS_PER_GROUP) * _ROWS_PER_GROUP)
    N_pad = pl.cdiv(N, TM) * TM
    num_tiles = N_pad // TM

    # Hoisted clamp: one vectorized XLA op instead of 2 scalar-ALU ops per row
    # inside the kernel.  (Clip matches JAX gather semantics; PyTorch
    # nn.Embedding would raise on out-of-range ids instead.)
    ids = jnp.clip(x.reshape(N).astype(jnp.int32), 0, V - 1)
    if N_pad != N:
        ids = jnp.pad(ids, (0, N_pad - N))

    itemsize = weight.dtype.itemsize
    table_bytes = V * D * itemsize
    out_tile_bytes = 2 * TM * D * itemsize       # double-buffered output tile
    ids_tile_bytes = 2 * TM * 4
    footprint = table_bytes + out_tile_bytes + ids_tile_bytes
    ceiling = _vmem_ceiling_bytes()
    vmem_limit = int(min(max(32 << 20, footprint + (4 << 20)), ceiling))

    if footprint + (4 << 20) > ceiling:
        # TODO(synk): streamed double-buffered row-gather DMA path for tables
        # too large to be VMEM-resident; plain XLA gather keeps semantics.
        return jnp.take(weight, ids[:N], axis=0).reshape(B, S, D)

    compiler_params = pltpu.CompilerParams(
        dimension_semantics=("parallel",),
        vmem_limit_bytes=vmem_limit,
    )

    if V <= ONEHOT_MAX_VOCAB:
        # Small-vocab fast path: one-hot matmul on the MXU.
        out_flat = pl.pallas_call(
            _embedding_onehot_kernel,
            out_shape=jax.ShapeDtypeStruct((N_pad, D), weight.dtype),
            grid=(num_tiles,),
            in_specs=[
                pl.BlockSpec((TM, 1), lambda t: (t, 0)),
                # Full table, untiled: one resident VMEM copy, no double buffer.
                pl.BlockSpec(memory_space=pltpu.MemorySpace.VMEM),
            ],
            out_specs=pl.BlockSpec((TM, D), lambda t: (t, 0)),
            compiler_params=compiler_params,
        )(ids.reshape(N_pad, 1), weight)
    else:
        # Large vocab: scalar-prefetched ids drive a direct row gather.
        out_flat = pl.pallas_call(
            _embedding_gather_kernel,
            out_shape=jax.ShapeDtypeStruct((N_pad, D), weight.dtype),
            grid_spec=pltpu.PrefetchScalarGridSpec(
                num_scalar_prefetch=1,               # token ids -> SMEM
                grid=(num_tiles,),
                in_specs=[
                    # Full table, untiled: one resident VMEM copy.
                    pl.BlockSpec(memory_space=pltpu.MemorySpace.VMEM),
                ],
                # index_map receives the scalar-prefetch ref as trailing arg.
                out_specs=pl.BlockSpec((TM, D), lambda t, ids_ref: (t, 0)),
            ),
            compiler_params=compiler_params,
        )(ids, weight)

    return out_flat[:N].reshape(B, S, D)


if __name__ == "__main__":
    key = jax.random.PRNGKey(0)
    k_w, k_x, k_w2, k_x2 = jax.random.split(key, 4)

    # Case 1: small vocab (one-hot MXU path), matching the module's forward:
    # x (batch, seq) -> (batch, seq, embedding_dim).  nn.Embedding init: N(0,1).
    batch_size, seq_length, vocab_size, embedding_dim = 2, 8, 64, 128
    weight = jax.random.normal(k_w, (vocab_size, embedding_dim), dtype=jnp.float32)
    x = jax.random.randint(k_x, (batch_size, seq_length), 0, vocab_size, jnp.int32)
    out = jax.block_until_ready(embedding_forward(x, weight))
    ref = weight[x]
    assert out.shape == (batch_size, seq_length, embedding_dim)
    assert jnp.allclose(out, ref, atol=1e-5), "one-hot path mismatch vs reference"

    # Case 2: larger vocab, exercises the row-gather kernel.
    vocab2, seq2 = 2048, 16
    weight2 = jax.random.normal(k_w2, (vocab2, embedding_dim), dtype=jnp.float32)
    x2 = jax.random.randint(k_x2, (batch_size, seq2), 0, vocab2, jnp.int32)
    out2 = jax.block_until_ready(embedding_forward(x2, weight2))
    ref2 = weight2[x2]
    assert out2.shape == (batch_size, seq2, embedding_dim)
    assert jnp.allclose(out2, ref2, atol=1e-6), "gather path mismatch vs reference"

    print("KERNEL_OK")
</pallas_src>

<mosaic_0001>
module attributes {stable_mosaic.version = 11 : i64} {
  func.func @_embedding_onehot_kernel(%arg0: i32, %arg1: memref<16x1xi32, #tpu.memory_space<vmem>>, %arg2: memref<64x128xf32, #tpu.memory_space<vmem>>, %arg3: memref<16x128xf32, #tpu.memory_space<vmem>>) attributes {dimension_semantics = [#tpu.dimension_semantics<parallel>], iteration_bounds = array<i64: 1>, scalar_prefetch = 0 : i64, scratch_operands = 0 : i64, tpu.core_type = #tpu.core_type<tc>, window_params = [{transform_indices = @transform_0, window_bounds = array<i64: 16, 1>}, {pipeline_mode = #tpu.pipeline_mode<synchronous>, transform_indices = @transform_1, window_bounds = array<i64: 64, 128>}, {transform_indices = @transform_2, window_bounds = array<i64: 16, 128>}]} {
    %c0 = arith.constant 0 : index
    %c0_0 = arith.constant 0 : index
    %0 = vector.load %arg1[%c0, %c0_0] : memref<16x1xi32, #tpu.memory_space<vmem>>, vector<16x1xi32>
    %1 = tpu.iota {dimensions = array<i32: 1>} : vector<16x64xi32>
    %2 = vector.broadcast %0 : vector<16x1xi32> to vector<16x64xi32>
    %3 = arith.cmpi eq, %1, %2 : vector<16x64xi32>
    %4 = arith.extui %3 : vector<16x64xi1> to vector<16x64xi32>
    %5 = arith.sitofp %4 : vector<16x64xi32> to vector<16x64xf32>
    %c0_1 = arith.constant 0 : index
    %c0_2 = arith.constant 0 : index
    %6 = vector.load %arg2[%c0_1, %c0_2] : memref<64x128xf32, #tpu.memory_space<vmem>>, vector<64x128xf32>
    %cst = arith.constant dense<0.000000e+00> : vector<16x128xf32>
    %7 = tpu.matmul %5, %6, %cst {dimension_numbers = #tpu.dot_dimension_numbers<[1], [0], [0], [1], [0, 0, 1, 1], [], []>} : vector<16x64xf32>, vector<64x128xf32>, vector<16x128xf32> -> vector<16x128xf32>
    %c0_3 = arith.constant 0 : index
    %c0_4 = arith.constant 0 : index
    %8 = vector.load %arg3[%c0_3, %c0_4] : memref<16x128xf32, #tpu.memory_space<vmem>>, vector<16x128xf32>
    tpu.vector_store %arg3[%c0_3, %c0_4], %7 {strides = array<i32>} : memref<16x128xf32, #tpu.memory_space<vmem>>, vector<16x128xf32>,
    return
  }
  func.func @transform_0(%arg0: i32) -> (i32, i32) {
    %c0_i32 = arith.constant 0 : i32
    %c0_i32_0 = arith.constant 0 : i32
    return %arg0, %c0_i32 : i32, i32
  }
  func.func @transform_1(%arg0: i32) -> (i32, i32) {
    %c0_i32 = arith.constant 0 : i32
    %c0_i32_0 = arith.constant 0 : i32
    %c0_i32_1 = arith.constant 0 : i32
    return %c0_i32, %c0_i32_0 : i32, i32
  }
  func.func @transform_2(%arg0: i32) -> (i32, i32) {
    %c0_i32 = arith.constant 0 : i32
    %c0_i32_0 = arith.constant 0 : i32
    return %arg0, %c0_i32 : i32, i32
  }
}

</mosaic_0001>

<bundles_post_ra>
// kernel: tpu_custom_call.1
= control target key start
LH: loop header
LB: loop body
LE: loop exit
PB: predicated region body
PF: predicated region fallthrough
CT: control target
= control target key end

     0   :  { %7 = vsyncpa [#allocation3], 0  ;;  %s274_s0 = inlined_call_operand.vmem [shape: s32[16,1], index: 0, kind: input, shape index: {}]   ;;  %s275_s1 = inlined_call_operand.hbm [shape: f32[64,128], index: 1, kind: input, shape index: {}]   ;;  %s276_s2 = inlined_call_operand.hbm [shape: f32[16,128], index: 2, kind: output, shape index: {}]  }
   0x1   :  { %8 = vsyncpa [#allocation4], 0  ;;  %s235_s9 = smov [#allocation2]  }
   0x2   :  { %s16_s10 = sshll.u32 %s235_s9, 4  ;;  %s17_s10 = int_to_ptr.vmem [resolvable:$true] %s16_s10 }
   0x3   :  { %s199_s11 = scalar_lea.vmem %s17_s10, 1024  ;;  %p204_p1 = scmp.lt.s32.totalorder %s17_s10, %s17_s10 }
   0x4   :  { %p200_p0 = scmp.ne.s32.totalorder %s17_s10, %s199_s11  ;;  %p205_p2 = scmp.lt.s32.totalorder %s199_s11, %s199_s11 }
   0x6   :  { %p206_p3 = por %p205_p2, %p204_p1 }
   0x8   :  { %p207_p4 = pnand %p206_p3, %p200_p0 }
   0xa   :  { %210 = shalt.err (!%p207_p4)
}
   0xb   :  { %s236_s12 = smov 128   ;;  %s237_s13 = smov 8  }
   0xc   :  { %22 = dma.hbm_to_vmem [thread:$0]  %s275_s1, 1024, %s17_s10, [#allocation3], %s236_s12, %s236_s12, %s237_s13  }
   0xd   :  { %231 = dma.done.wait [#allocation3], 1024  }
   0xe   :  { %232 = vsyncadd [#allocation3], 4294966272  ;;  %v238_v0 = vmov 0   ;;  %v26_v1 = vld [vmem:[%s274_s0] sm:$0xff]  ;;  %v49_v2 = vld [vmem:[#allocation2 + $0x38] sm:$0xff]  ;;  %v28_v11 = vlaneseq  ;;  %vm50_vm0 = vcmask 523264  }
   0xf   :  { %190 = vset.pattern.permute.xlu0 %v238_v0  ;;  %165 = vmatprep.subr.mxu0 %v49_v2  ;;  %v48_v3 = vld [vmem:[#allocation2 + $0x30] sm:$0xff]  ;;  %v27_v4 = vld [vmem:[%s274_s0 + $0x8] sm:$0xff]  ;;  %v46_v6 = vld [vmem:[#allocation2 + $0x20] sm:$0xff]  ;;  %v239_v14 = vmov 0.0   ;;  %s240_s0 = smov [#allocation5]  }
  0x10   :  { %31 = vperm.xlu0 %190, %v26_v1   ;;  %166 = vmatpush3.msra.mxu0 %v49_v2  ;;  %v47_v5 = vld [vmem:[#allocation2 + $0x28] sm:$0xff]  ;;  %v45_v7 = vld [vmem:[#allocation2 + $0x18] sm:$0xff]  ;;  %v44_v8 = vld [vmem:[#allocation2 + $0x10] sm:$0xff]  ;;  %v29_v12 = vand.u32 127, %v28_v11  ;;  %s139_s1 = sshll.u32 %s240_s0, 4  ;;  %s140_s1 = int_to_ptr.vmem [resolvable:$true] %s139_s1 }
  0x11   :  { %167 = vmatprep.subr.mxu0 %v48_v3  ;;  %v43_v9 = vld [vmem:[#allocation2 + $0x8] sm:$0xff]  ;;  %v42_v10 = vld [vmem:[#allocation2] sm:$0xff]  ;;  %s211_s20 = scalar_lea.vmem %s140_s1, 256  ;;  %p216_p6 = scmp.lt.s32.totalorder %s140_s1, %s140_s1 }
  0x12   :  { %168 = vmatpush3.msra.mxu0 %v48_v3  ;;  %p212_p5 = scmp.ne.s32.totalorder %s140_s1, %s211_s20  ;;  %p217_p7 = scmp.lt.s32.totalorder %s211_s20, %s211_s20 }
  0x13   :  { %169 = vmatprep.subr.mxu0 %v47_v5 }
  0x14   :  { %34 = vperm.xlu0 %190, %v27_v4   ;;  %170 = vmatpush3.msra.mxu0 %v47_v5  ;;  %p218_p8 = por %p217_p7, %p216_p6 }
  0x15   :  { %171 = vmatprep.subr.mxu0 %v46_v6 }
  0x16   :  { %172 = vmatpush3.msra.mxu0 %v46_v6  ;;  %p219_p9 = pnand %p218_p8, %p212_p5 }
  0x17   :  { %173 = vmatprep.subr.mxu0 %v45_v7 }
  0x18   :  { %174 = vmatpush3.msra.mxu0 %v45_v7 }
  0x19   :  { %175 = vmatprep.subr.mxu0 %v44_v8 }
  0x1a   :  { %176 = vmatpush3.msra.mxu0 %v44_v8 }
  0x1b   :  { %177 = vmatprep.subr.mxu0 %v43_v9 }
  0x1c   :  { %178 = vmatpush3.msra.mxu0 %v43_v9 }
  0x1d   :  { %179 = vmatprep.subr.mxu0 %v42_v10 }
  0x1e   :  { %180 = vmatpush3.msra.mxu0 %v42_v10 }
  0x8b   :  { %v32_v13 = vpop.permute.xlu0 %31 }
  0x8c   :  { %vm36_vm1 = vcmp.eq.s32.totalorder %v29_v12, %v32_v13 }
  0x8d   :  { %v151_v15 = vsel %vm36_vm1, 1.0, %v239_v14 }
  0x8e   :  { %181 = vmatprep.mubr.msk.f32.mxu0 %vm50_vm0, %v151_v15 }
  0x8f   :  { %v35_v16 = vpop.permute.xlu0 %34 }
  0x90   :  { %vm37_vm2 = vcmp.eq.s32.totalorder %v29_v12, %v35_v16 }
  0x91   :  { %v152_v17 = vsel %vm37_vm2, 1.0, %v239_v14 }
  0x92   :  { %182 = vmatmul.mubr.msk.f32.vlgmr.msra.gmra.mxu0 %vm50_vm0, %v152_v17 }
 0x152   :  { %v183_v18 = vpop.f32.mrf.mxu0 }
 0x153   :  { %133 = vst [vmem:[#allocation5 + $0x8] sm:$0xff] %v183_v18 }
 0x154   :  { %v123_v19 = vpop.f32.mrf.mxu0 }
 0x155   :  { %132 = vst [vmem:[#allocation5] sm:$0xff] %v123_v19 }
 0x156   :  { %222 = shalt.err (!%p219_p9)
}
 0x157   :  { %145 = dma.vmem_to_hbm [thread:$0]  %s140_s1, 256, %s276_s2, [#allocation4], %s236_s12, %s236_s12, %s237_s13  }
 0x158   :  { %233 = dma.done.wait [#allocation4], 256  }
 0x159   :  { %234 = vsyncadd [#allocation4], 4294967040 }
 0x15a   :  { %149 = vsyncpa [#allocation3], 1 }
 0x15b   :  { %150 = vsyncpa [#allocation4], 1 }

</bundles_post_ra>
